<compile_context>
chip_gen: v7x
topology: tpu7x:2x2x1
jax: 0.10.0
libtpu: 0.0.40
codegen_flags: <defaults>
</compile_context>

<pallas_src>
import functools
import math

import jax
import jax.numpy as jnp
from jax.experimental import pallas as pl
from jax.experimental.pallas import tpu as pltpu


def _attend_kernel(lens_ref, q_ref, text_ref, out_ref, *, scale, use_mask):
    """One grid step processes a block of TB batch rows.

    lens_ref : VMEM (TB, 1)  int32   sentence lengths
    q_ref    : VMEM (TB, E)          question embeddings
    text_ref : VMEM (TB, S, E)       sentence embeddings
    out_ref  : VMEM (TB, E)          attended output
    """
    q = q_ref[...].astype(jnp.float32)       # (TB, E)
    t = text_ref[...].astype(jnp.float32)    # (TB, S, E)

    # scores[b, s] = <q[b], t[b, s]> * scale
    # VPU multiply + lane reduction: avoids an XLU transpose of the (S, E) tile
    # and TB separate 1-row MXU matvecs.
    scores = jnp.sum(q[:, None, :] * t, axis=-1) * scale    # (TB, S) f32

    if use_mask:
        # masked_fill(position >= text_len, -1e9), built once per block.
        pos = jax.lax.broadcasted_iota(jnp.int32, scores.shape, 1)  # (TB, S)
        scores = jnp.where(pos < lens_ref[...], scores, jnp.float32(-1e9))

    # softmax over the sentence axis
    m = jnp.max(scores, axis=-1, keepdims=True)
    e = jnp.exp(scores - m)
    denom = jnp.sum(e, axis=-1, keepdims=True)
    p = e * pl.reciprocal(denom, approx=True)                # (TB, S), EUP recip

    # out[b] = sum_s p[b, s] * t[b, s]   (VPU multiply + sublane reduction)
    out = jnp.sum(p[:, :, None] * t, axis=1)                 # (TB, E)
    out_ref[...] = out.astype(out_ref.dtype)


def _choose_block_b(B, S, E, itemsize):
    """Batch rows per grid step, sized against a conservative VMEM budget."""
    # Per batch row: double-buffered text input + ~3 f32 compute intermediates.
    bytes_per_row = S * E * (2 * itemsize + 3 * 4)
    budget = 8 * 1024 * 1024                    # conservative: fits every gen
    tb = max(1, budget // bytes_per_row)
    tb = int(min(tb, 128))
    if B <= tb:
        return B                                # single block == full batch
    return max(8, tb - tb % 8)                  # sublane-friendly multiple of 8


def attend_layer(text_emb, text_lens, question_emb, *, mask=True):
    """Pallas implementation of AttendLayer.forward (eval mode, dropout=None)."""
    B, S, E = text_emb.shape
    assert question_emb.shape == (B, E)
    itemsize = jnp.dtype(text_emb.dtype).itemsize

    tb = _choose_block_b(B, S, E, itemsize)
    b_pad = pl.cdiv(B, tb) * tb
    if b_pad != B:
        pad = b_pad - B
        text_emb = jnp.pad(text_emb, ((0, pad), (0, 0), (0, 0)))
        question_emb = jnp.pad(question_emb, ((0, pad), (0, 0)))
        text_lens = jnp.pad(text_lens, ((0, pad),))
    lens2d = text_lens.astype(jnp.int32)[:, None]            # (b_pad, 1)

    kernel = functools.partial(
        _attend_kernel, scale=1.0 / math.sqrt(E), use_mask=mask
    )

    cost = pl.CostEstimate(
        flops=4 * b_pad * S * E,
        transcendentals=b_pad * S + b_pad,
        bytes_accessed=(b_pad * S * E + 2 * b_pad * E) * itemsize + b_pad * 4,
    )

    out = pl.pallas_call(
        kernel,
        out_shape=jax.ShapeDtypeStruct((b_pad, E), text_emb.dtype),
        grid=(b_pad // tb,),
        in_specs=[
            pl.BlockSpec((tb, 1), lambda i: (i, 0)),         # text_lens
            pl.BlockSpec((tb, E), lambda i: (i, 0)),         # question
            pl.BlockSpec((tb, S, E), lambda i: (i, 0, 0)),   # text
        ],
        out_specs=pl.BlockSpec((tb, E), lambda i: (i, 0)),
        compiler_params=pltpu.CompilerParams(
            dimension_semantics=("parallel",),
            vmem_limit_bytes=32 * 1024 * 1024,
        ),
        cost_estimate=cost,
    )(lens2d, question_emb, text_emb)

    # Drop the (zero-filled, fully masked) padding rows, if any.
    return out[:B]


def _reference(text_emb, text_lens, question_emb, *, mask=True):
    """Pure-JAX reference of the same forward pass (silent sanity check)."""
    B, S, E = text_emb.shape
    q = question_emb[:, None, :]                                   # [B,1,E]
    scores = jnp.einsum("bqe,bse->bqs", q, text_emb) / math.sqrt(E)
    if mask:
        pos = jnp.arange(S)[None, None, :]
        scores = jnp.where(pos < text_lens[:, None, None], scores, -1e9)
    p = jax.nn.softmax(scores, axis=-1)
    out = jnp.einsum("bqs,bse->bqe", p, text_emb)
    return jnp.squeeze(out, axis=1)


if __name__ == "__main__":
    # Small shapes consistent with the module: batch=2, sentence_count=8, embedding=32.
    B, S, E = 2, 8, 32
    key = jax.random.PRNGKey(0)
    k1, k2 = jax.random.split(key)

    text_emb = jax.random.normal(k1, (B, S, E), dtype=jnp.float32)
    question_emb = jax.random.normal(k2, (B, E), dtype=jnp.float32)
    text_lens = jnp.array([5, 8], dtype=jnp.int32)

    out = attend_layer(text_emb, text_lens, question_emb, mask=True)
    out = jax.block_until_ready(out)

    ref = _reference(text_emb, text_lens, question_emb, mask=True)
    assert out.shape == (B, E)
    # Tolerance loosened slightly: pl.reciprocal(approx=True) (EUP vrcp) perturbs
    # the softmax normalization at the ~1e-4 relative level.
    assert jnp.allclose(out, ref, atol=5e-3, rtol=5e-3)

    print("KERNEL_OK")
</pallas_src>

<mosaic_0001>
module attributes {stable_mosaic.version = 11 : i64} {
  func.func @_attend_kernel(%arg0: i32, %arg1: memref<2x1xi32, #tpu.memory_space<vmem>>, %arg2: memref<2x32xf32, #tpu.memory_space<vmem>>, %arg3: memref<2x8x32xf32, #tpu.memory_space<vmem>>, %arg4: memref<2x32xf32, #tpu.memory_space<vmem>>) attributes {dimension_semantics = [#tpu.dimension_semantics<parallel>], iteration_bounds = array<i64: 1>, scalar_prefetch = 0 : i64, scratch_operands = 0 : i64, tpu.core_type = #tpu.core_type<tc>, window_params = [{transform_indices = @transform_0, window_bounds = array<i64: 2, 1>}, {transform_indices = @transform_1, window_bounds = array<i64: 2, 32>}, {transform_indices = @transform_2, window_bounds = array<i64: 2, 8, 32>}, {transform_indices = @transform_3, window_bounds = array<i64: 2, 32>}]} {
    %c0 = arith.constant 0 : index
    %c0_0 = arith.constant 0 : index
    %0 = vector.load %arg2[%c0, %c0_0] : memref<2x32xf32, #tpu.memory_space<vmem>>, vector<2x32xf32>
    %c0_1 = arith.constant 0 : index
    %c0_2 = arith.constant 0 : index
    %c0_3 = arith.constant 0 : index
    %1 = vector.load %arg3[%c0_1, %c0_2, %c0_3] : memref<2x8x32xf32, #tpu.memory_space<vmem>>, vector<2x8x32xf32>
    %2 = vector.shape_cast %0 : vector<2x32xf32> to vector<2x1x32xf32>
    %3 = vector.broadcast %2 : vector<2x1x32xf32> to vector<2x8x32xf32>
    %4 = arith.mulf %3, %1 : vector<2x8x32xf32>
    %cst = arith.constant dense<0.000000e+00> : vector<2x8xf32>
    %5 = vector.multi_reduction <add>, %4, %cst [2] : vector<2x8x32xf32> to vector<2x8xf32>
    %cst_4 = arith.constant 0.176776692 : f32
    %6 = vector.broadcast %cst_4 : f32 to vector<2x8xf32>
    %7 = arith.mulf %5, %6 : vector<2x8xf32>
    %8 = tpu.iota {dimensions = array<i32: 1>} : vector<2x8xi32>
    %c0_5 = arith.constant 0 : index
    %c0_6 = arith.constant 0 : index
    %9 = vector.load %arg1[%c0_5, %c0_6] : memref<2x1xi32, #tpu.memory_space<vmem>>, vector<2x1xi32>
    %10 = vector.broadcast %9 : vector<2x1xi32> to vector<2x8xi32>
    %11 = arith.cmpi slt, %8, %10 : vector<2x8xi32>
    %cst_7 = arith.constant -1.000000e+09 : f32
    %12 = vector.broadcast %cst_7 : f32 to vector<2x8xf32>
    %13 = arith.select %11, %7, %12 : vector<2x8xi1>, vector<2x8xf32>
    %cst_8 = arith.constant dense<0xFF800000> : vector<2xf32>
    %14 = vector.multi_reduction <maximumf>, %13, %cst_8 [1] : vector<2x8xf32> to vector<2xf32>
    %15 = vector.shape_cast %14 : vector<2xf32> to vector<2x1xf32>
    %16 = vector.broadcast %15 : vector<2x1xf32> to vector<2x8xf32>
    %17 = arith.subf %13, %16 : vector<2x8xf32>
    %18 = math.exp %17 : vector<2x8xf32>
    %cst_9 = arith.constant dense<0.000000e+00> : vector<2xf32>
    %19 = vector.multi_reduction <add>, %18, %cst_9 [1] : vector<2x8xf32> to vector<2xf32>
    %20 = vector.shape_cast %19 : vector<2xf32> to vector<2x1xf32>
    %21 = tpu.reciprocal %20 {approx = true} : vector<2x1xf32> -> vector<2x1xf32>
    %22 = vector.broadcast %21 : vector<2x1xf32> to vector<2x8xf32>
    %23 = arith.mulf %18, %22 : vector<2x8xf32>
    %24 = vector.shape_cast %23 : vector<2x8xf32> to vector<2x8x1xf32>
    %25 = vector.broadcast %24 : vector<2x8x1xf32> to vector<2x8x32xf32>
    %26 = arith.mulf %25, %1 : vector<2x8x32xf32>
    %cst_10 = arith.constant dense<0.000000e+00> : vector<2x32xf32>
    %27 = vector.multi_reduction <add>, %26, %cst_10 [1] : vector<2x8x32xf32> to vector<2x32xf32>
    %c0_11 = arith.constant 0 : index
    %c0_12 = arith.constant 0 : index
    %28 = vector.load %arg4[%c0_11, %c0_12] : memref<2x32xf32, #tpu.memory_space<vmem>>, vector<2x32xf32>
    tpu.vector_store %arg4[%c0_11, %c0_12], %27 {strides = array<i32>} : memref<2x32xf32, #tpu.memory_space<vmem>>, vector<2x32xf32>,
    return
  }
  func.func @transform_0(%arg0: i32) -> (i32, i32) {
    %c0_i32 = arith.constant 0 : i32
    %c0_i32_0 = arith.constant 0 : i32
    return %arg0, %c0_i32 : i32, i32
  }
  func.func @transform_1(%arg0: i32) -> (i32, i32) {
    %c0_i32 = arith.constant 0 : i32
    %c0_i32_0 = arith.constant 0 : i32
    return %arg0, %c0_i32 : i32, i32
  }
  func.func @transform_2(%arg0: i32) -> (i32, i32, i32) {
    %c0_i32 = arith.constant 0 : i32
    %c0_i32_0 = arith.constant 0 : i32
    %c0_i32_1 = arith.constant 0 : i32
    return %arg0, %c0_i32, %c0_i32_0 : i32, i32, i32
  }
  func.func @transform_3(%arg0: i32) -> (i32, i32) {
    %c0_i32 = arith.constant 0 : i32
    %c0_i32_0 = arith.constant 0 : i32
    return %arg0, %c0_i32 : i32, i32
  }
}

</mosaic_0001>

<bundles_post_ra>
// kernel: tpu_custom_call.1
= control target key start
LH: loop header
LB: loop body
LE: loop exit
PB: predicated region body
PF: predicated region fallthrough
CT: control target
= control target key end

     0   :  { %8 = vsyncpa [#allocation3], 0  ;;  %s283_s0 = inlined_call_operand.vmem [shape: s32[2,1], index: 0, kind: input, shape index: {}]   ;;  %s284_s1 = inlined_call_operand.vmem [shape: f32[2,32], index: 1, kind: input, shape index: {}]   ;;  %s285_s2 = inlined_call_operand.hbm [shape: f32[2,8,32], index: 2, kind: input, shape index: {}]   ;;  %s286_s3 = inlined_call_operand.hbm [shape: f32[2,32], index: 3, kind: output, shape index: {}]  }
   0x1   :  { %9 = vsyncpa [#allocation4], 0  ;;  %s221_s12 = smov [#allocation2]   ;;  %s173_s16 = scalar_lea.hbm %s285_s2, 256 }
   0x2   :  { %s19_s13 = sshll.u32 %s221_s12, 4  ;;  %p174_p0 = scmp.ne.s32.totalorder %s285_s2, %s173_s16  ;;  %s20_s13 = int_to_ptr.vmem [resolvable:$true] %s19_s13 }
   0x3   :  { %p177_p1 = scmp.lt.u32.totalorder %s173_s16, %s285_s2 }
   0x5   :  { %p179_p2 = pnand %p177_p1, %p174_p0 }
   0x7   :  { %182 = shalt.err (!%p179_p2)
}
   0x8   :  { %s183_s21 = scalar_lea.vmem %s20_s13, 256  ;;  %p188_p4 = scmp.lt.s32.totalorder %s20_s13, %s20_s13 }
   0x9   :  { %p184_p3 = scmp.ne.s32.totalorder %s20_s13, %s183_s21  ;;  %p189_p5 = scmp.lt.s32.totalorder %s183_s21, %s183_s21 }
   0xb   :  { %p190_p6 = por %p189_p5, %p188_p4 }
   0xd   :  { %p191_p7 = pnand %p190_p6, %p184_p3 }
   0xf   :  { %194 = shalt.err (!%p191_p7)
}
  0x10   :  { %s222_s22 = smov 128   ;;  %s223_s23 = smov 8  }
  0x11   :  { %25 = dma.hbm_to_vmem [thread:$0]  %s285_s2, 256, %s20_s13, [#allocation3], %s222_s22, %s222_s22, %s223_s23  }
  0x12   :  { %217 = dma.done.wait [#allocation3], 256  }
  0x13   :  { %218 = vsyncadd [#allocation3], 4294967040  ;;  %v44_v0 = vlaneseq  ;;  %v224_v1 = vmov 1966171168   ;;  %v225_v3 = vmov 0   ;;  %v30_v12 = vld [vmem:[#allocation2] sm:$0xff] }
  0x14   :  { %v42_v2 = vunpack.c.l.s4 %v224_v1  ;;  %167 = vset.pattern.permute.xlu1 %v225_v3  ;;  %168 = vset.pattern.permute.xlu0 %v225_v3  ;;  %v160_v8 = vld.sshfl [vmem:[%s284_s1] sm:$0x11 pattern:$0x75316420]  ;;  %vm67_vm0 = vcmask 261120   ;;  %v31_v15 = vld [vmem:[#allocation2 + $0x8] sm:$0xff] }
  0x15   :  { %v45_v4 = vshrl.u32 %v44_v0, 7  ;;  %v40_v10 = vcombine.high %v160_v8, %v160_v8  ;;  %v78_v11 = vld [vmem:[%s283_s0] sm:$0x3]  ;;  %v77_v21 = vand.u32 127, %v44_v0  ;;  %vm93_vm1 = vcmask 1041409   ;;  %s226_s0 = smov [#allocation5]  }
  0x16   :  { %v43_v5 = vunpack.c.0.s8 %v42_v2  ;;  %80 = vperm.xlu1 %167, %v78_v11   ;;  %vm97_vm3 = vcmask 58368   ;;  %s151_s1 = sshll.u32 %s226_s0, 4  ;;  %vm143_vm4 = vcmask 254976   ;;  %s152_s1 = int_to_ptr.vmem [resolvable:$true] %s151_s1 }
  0x17   :  { %v57_v7 = vsub.s32 0, %v45_v4  ;;  %v87_v23 = vsub.s32 %v77_v21, %v45_v4  ;;  %v118_v42 = vsub.s32 1, %v45_v4  ;;  %s195_s29 = scalar_lea.vmem %s152_s1, 32  ;;  %p200_p9 = scmp.lt.s32.totalorder %s152_s1, %s152_s1 }
  0x18   :  { %v46_v6 = vsub.s32 %v43_v5, %v45_v4  ;;  %p196_p8 = scmp.ne.s32.totalorder %s152_s1, %s195_s29  ;;  %p201_p10 = scmp.lt.s32.totalorder %s195_s29, %s195_s29 }
  0x1a   :  { %v47_v9 = vrot.slane %v160_v8, %v46_v6  ;;  %v54_v14 = vrot.slane %v40_v10, %v46_v6  ;;  %p202_p11 = por %p201_p10, %p200_p9 }
  0x1c   :  { %v58_v13 = vrot.slane %v47_v9, %v57_v7  ;;  %v62_v17 = vrot.slane %v54_v14, %v57_v7  ;;  %p203_p12 = pnand %p202_p11, %p196_p8 }
  0x1e   :  { %v65_v16 = vmul.f32 %v58_v13, %v30_v12  ;;  %v66_v19 = vmul.f32 %v62_v17, %v31_v15 }
  0x20   :  { %v68_v18 = vsel %vm67_vm0, %v65_v16, 0.0  ;;  %v71_v20 = vsel %vm67_vm0, %v66_v19, 0.0 }
  0x21   :  { %69 = vadd.xlane.f32.xlu0 %v68_v18 }
  0x25   :  { %72 = vadd.xlane.f32.xlu0 %v71_v20 }
  0x95   :  { %v81_v26 = vpop.permute.xlu1 %80 }
  0x96   :  { %vm82_vm2 = vcmp.lt.s32.totalorder %v77_v21, %v81_v26 }
  0xae   :  { %v70_v22 = vpop.xlane.xlu0 %69 }
  0xaf   :  { %v74_v24 = vmul.f32 0.17677669, %v70_v22 }
  0xb1   :  { %v88_v28 = vrot.slane %v74_v24, %v87_v23 }
  0xb2   :  { %v73_v25 = vpop.xlane.xlu0 %72 }
  0xb3   :  { %v75_v27 = vmul.f32 0.17677669, %v73_v25 }
  0xb5   :  { %v92_v29 = vrot.slane %v75_v27, %v87_v23 }
  0xb7   :  { %v94_v30 = vsel %vm93_vm1, %v92_v29, %v88_v28 }
  0xb8   :  { %v96_v31 = vsel %vm82_vm2, %v94_v30, -1e+09 }
  0xb9   :  { %v98_v32 = vsel %vm97_vm3, %v96_v31, -inf }
  0xba   :  { %99 = vmax.xlane.f32.xlu1 %v98_v32 }
 0x147   :  { %v100_v33 = vpop.xlane.xlu1 %99 }
 0x148   :  { %v101_v34 = vsub.f32 %v96_v31, %v100_v33 }
 0x14a   :  { %v102_v35 = vmul.f32 1.442695, %v101_v34 }
 0x14c   :  { %169 = vpow2.f32 %v102_v35 }
 0x156   :  { %v170_v36 = vpop.eup %169 }
 0x157   :  { %v104_v37 = vsel %vm97_vm3, %v170_v36, 0.0 }
 0x158   :  { %105 = vadd.xlane.f32.xlu0 %v104_v37 }
 0x1e5   :  { %v106_v38 = vpop.xlane.xlu0 %105 }
 0x1e6   :  { %171 = vrcp.f32 %v106_v38 }
 0x1f0   :  { %v172_v39 = vpop.eup %171 }
 0x1f1   :  { %v108_v40 = vmul.f32 %v172_v39, %v170_v36 }
 0x1f3   :  { %v112_v41 = vrot.slane %v108_v40, %v57_v7  ;;  %v119_v43 = vrot.slane %v108_v40, %v118_v42 }
 0x1f5   :  { %114 = vbcast.lane.b32.xlu0 %v112_v41, 256 }
 0x1f9   :  { %121 = vbcast.lane.b32.xlu0 %v119_v43, 256 }
 0x267   :  { %v115_v44 = vpop.permute.xlu0 %114 }
 0x268   :  { %v123_v45 = vmul.f32 %v115_v44, %v30_v12 }
 0x26a   :  { %v125_v46 = vsel %vm67_vm0, %v123_v45, 0.0 }
 0x26b   :  { %v126_v47 = vrot.slane %v125_v46, 4  ;;  %v122_v48 = vpop.permute.xlu0 %121 }
 0x26c   :  { %v124_v49 = vmul.f32 %v122_v48, %v31_v15 }
 0x26d   :  { %v127_v50 = vadd.f32 %v126_v47, %v125_v46 }
 0x26e   :  { %v132_v51 = vsel %vm67_vm0, %v124_v49, 0.0 }
 0x26f   :  { %v128_v52 = vrot.slane %v127_v50, 2  ;;  %v133_v53 = vrot.slane %v132_v51, 4 }
 0x271   :  { %v129_v54 = vadd.f32 %v128_v52, %v127_v50  ;;  %v134_v55 = vadd.f32 %v133_v53, %v132_v51 }
 0x273   :  { %v135_v56 = vrot.slane %v134_v55, 2  ;;  %v130_v57 = vrot.slane %v129_v54, 1 }
 0x275   :  { %v136_v58 = vadd.f32 %v135_v56, %v134_v55  ;;  %v131_v60 = vadd.f32 %v130_v57, %v129_v54 }
 0x277   :  { %v137_v59 = vrot.slane %v136_v58, 1 }
 0x279   :  { %v138_v61 = vadd.f32 %v137_v59, %v136_v58 }
 0x27b   :  { %v141_v62 = vsel %vm93_vm1, %v138_v61, %v131_v60 }
 0x27c   :  { %144 = vst.msk [vmem:[#allocation5] sm:$0x3] %vm143_vm4, %v141_v62 }
 0x27d   :  { %206 = shalt.err (!%p203_p12)
}
 0x27e   :  { %s207_s5 = scalar_lea.hbm %s286_s3, 32 }
 0x27f   :  { %p208_p13 = scmp.ne.s32.totalorder %s286_s3, %s207_s5  ;;  %p211_p0 = scmp.lt.u32.totalorder %s207_s5, %s286_s3 }
 0x281   :  { %p213_p1 = pnand %p211_p0, %p208_p13 }
 0x283   :  { %216 = shalt.err (!%p213_p1)
}
 0x284   :  { %154 = dma.vmem_to_hbm [thread:$0]  %s152_s1, 32, %s286_s3, [#allocation4]  }
 0x285   :  { %219 = dma.done.wait [#allocation4], 32  }
 0x286   :  { %220 = vsyncadd [#allocation4], 4294967264 }
 0x287   :  { %158 = vsyncpa [#allocation3], 1 }
 0x288   :  { %159 = vsyncpa [#allocation4], 1 }

</bundles_post_ra>
